<compile_context>
chip_gen: v7x
topology: tpu7x:2x2x1
jax: 0.10.0
libtpu: 0.0.40
codegen_flags: <defaults>
</compile_context>

<pallas_src>
import jax
import jax.numpy as jnp
from jax.experimental import pallas as pl
from jax.experimental.pallas import tpu as pltpu

LANE = 128  # TPU lane width
SUBLANE = 8


def _mlp_kernel(x_ref, w1_ref, b1_ref, w3_ref, b3_ref, o_ref):
    # First linear (MXU, f32 accumulate) -> bias + ReLU in f32 (VPU).
    h = jnp.dot(x_ref[...], w1_ref[...], preferred_element_type=jnp.float32)
    h = jnp.maximum(h + b1_ref[...], 0.0)
    # Second linear; cast activations to the weight dtype so bf16 weights take
    # the bf16 MXU path, still accumulating in f32.
    o = jnp.dot(h.astype(w3_ref.dtype), w3_ref[...],
                preferred_element_type=jnp.float32)
    o_ref[...] = (o + b3_ref[...]).astype(o_ref.dtype)


def net_forward(x, w1, b1, w3, b3, *, use_bf16=True, tb=1024):
    """x: [B, in_f] f32; w1: [in_f, 64]; b1: [64]; w3: [64, out_f]; b3: [out_f]."""
    B, in_f = x.shape
    hidden = w1.shape[1]
    out_f = w3.shape[1]

    # Pad output feature dim to a full lane width (lane-dense, unmasked stores).
    out_pad = max(LANE, ((out_f + LANE - 1) // LANE) * LANE)

    # Pad batch to a multiple of the batch tile (TB itself a multiple of 8).
    b8 = ((B + SUBLANE - 1) // SUBLANE) * SUBLANE
    tb8 = max(SUBLANE, ((tb + SUBLANE - 1) // SUBLANE) * SUBLANE)
    TB = min(b8, tb8)
    B_pad = ((b8 + TB - 1) // TB) * TB

    x_p = x if B_pad == B else jnp.pad(x, ((0, B_pad - B), (0, 0)))
    w3_p = jnp.pad(w3, ((0, 0), (0, out_pad - out_f)))
    b3_p = jnp.pad(b3, ((0, out_pad - out_f),))

    if use_bf16:
        # bf16 MXU inputs (halves x/weight HBM bytes); biases / epilogue stay f32.
        x_p = x_p.astype(jnp.bfloat16)
        w1_c = w1.astype(jnp.bfloat16)
        w3_p = w3_p.astype(jnp.bfloat16)
    else:
        w1_c = w1

    out_padded = pl.pallas_call(
        _mlp_kernel,
        out_shape=jax.ShapeDtypeStruct((B_pad, out_pad), jnp.float32),
        grid_spec=pltpu.PrefetchScalarGridSpec(
            num_scalar_prefetch=0,
            grid=(B_pad // TB,),
            in_specs=[
                pl.BlockSpec((TB, in_f), lambda i: (i, 0)),         # x tile
                pl.BlockSpec((in_f, hidden), lambda i: (0, 0)),     # w1 (resident)
                pl.BlockSpec((1, hidden), lambda i: (0, 0)),        # b1 (resident)
                pl.BlockSpec((hidden, out_pad), lambda i: (0, 0)),  # w3 (resident)
                pl.BlockSpec((1, out_pad), lambda i: (0, 0)),       # b3 (resident)
            ],
            out_specs=pl.BlockSpec((TB, out_pad), lambda i: (i, 0)),
        ),
        compiler_params=pltpu.CompilerParams(
            dimension_semantics=("parallel",),      # shard batch across TCs (v7x)
            vmem_limit_bytes=32 * 1024 * 1024,      # explicit budget (v7x-safe)
        ),
    )(x_p, w1_c, b1.reshape(1, hidden), w3_p, b3_p.reshape(1, out_pad))

    return out_padded[:B, :out_f]


def init_params(key, in_features, out_features, hidden=64):
    """PyTorch-style uniform(-1/sqrt(fan_in), 1/sqrt(fan_in)) init, [in, out] layout."""
    k1, k2, k3, k4 = jax.random.split(key, 4)
    bound1 = 1.0 / jnp.sqrt(in_features)
    bound3 = 1.0 / jnp.sqrt(hidden)
    w1 = jax.random.uniform(k1, (in_features, hidden), jnp.float32, -bound1, bound1)
    b1 = jax.random.uniform(k2, (hidden,), jnp.float32, -bound1, bound1)
    w3 = jax.random.uniform(k3, (hidden, out_features), jnp.float32, -bound3, bound3)
    b3 = jax.random.uniform(k4, (out_features,), jnp.float32, -bound3, bound3)
    return w1, b1, w3, b3


def _reference(x, w1, b1, w3, b3):
    return jnp.maximum(x @ w1 + b1, 0.0) @ w3 + b3


if __name__ == "__main__":
    in_features = 16
    out_features = 2

    key = jax.random.PRNGKey(0)
    kx, kp, kx2 = jax.random.split(key, 3)
    w1, b1, w3, b3 = init_params(kp, in_features, out_features)

    # --- Test 1: small batch, f32 matmul path, single grid step ---
    batch = 8
    x = jax.random.normal(kx, (batch, in_features), jnp.float32)
    out = jax.block_until_ready(net_forward(x, w1, b1, w3, b3, use_bf16=False))
    ref = _reference(x, w1, b1, w3, b3)
    assert out.shape == (batch, out_features)
    assert jnp.allclose(out, ref, atol=1e-5, rtol=1e-5)

    # --- Test 2: tiled batch (grid > 1, pipelined), bf16 MXU inputs ---
    batch2 = 24
    x2 = jax.random.normal(kx2, (batch2, in_features), jnp.float32)
    out2 = jax.block_until_ready(
        net_forward(x2, w1, b1, w3, b3, use_bf16=True, tb=8))
    ref2 = _reference(x2, w1, b1, w3, b3)
    assert out2.shape == (batch2, out_features)
    assert jnp.allclose(out2, ref2, atol=5e-2, rtol=5e-2)

    print("KERNEL_OK")
</pallas_src>

<mosaic_0001>
module attributes {stable_mosaic.version = 11 : i64} {
  func.func @_mlp_kernel(%arg0: i32, %arg1: memref<8x16xf32, #tpu.memory_space<vmem>>, %arg2: memref<16x64xf32, #tpu.memory_space<vmem>>, %arg3: memref<1x64xf32, #tpu.memory_space<vmem>>, %arg4: memref<64x128xf32, #tpu.memory_space<vmem>>, %arg5: memref<1x128xf32, #tpu.memory_space<vmem>>, %arg6: memref<8x128xf32, #tpu.memory_space<vmem>>) attributes {dimension_semantics = [#tpu.dimension_semantics<parallel>], iteration_bounds = array<i64: 1>, scalar_prefetch = 0 : i64, scratch_operands = 0 : i64, tpu.core_type = #tpu.core_type<tc>, window_params = [{transform_indices = @transform_0, window_bounds = array<i64: 8, 16>}, {pipeline_mode = #tpu.pipeline_mode<synchronous>, transform_indices = @transform_1, window_bounds = array<i64: 16, 64>}, {pipeline_mode = #tpu.pipeline_mode<synchronous>, transform_indices = @transform_2, window_bounds = array<i64: 1, 64>}, {pipeline_mode = #tpu.pipeline_mode<synchronous>, transform_indices = @transform_3, window_bounds = array<i64: 64, 128>}, {pipeline_mode = #tpu.pipeline_mode<synchronous>, transform_indices = @transform_4, window_bounds = array<i64: 1, 128>}, {transform_indices = @transform_5, window_bounds = array<i64: 8, 128>}]} {
    %c0 = arith.constant 0 : index
    %c0_0 = arith.constant 0 : index
    %0 = vector.load %arg1[%c0, %c0_0] : memref<8x16xf32, #tpu.memory_space<vmem>>, vector<8x16xf32>
    %c0_1 = arith.constant 0 : index
    %c0_2 = arith.constant 0 : index
    %1 = vector.load %arg2[%c0_1, %c0_2] : memref<16x64xf32, #tpu.memory_space<vmem>>, vector<16x64xf32>
    %cst = arith.constant dense<0.000000e+00> : vector<8x64xf32>
    %2 = tpu.matmul %0, %1, %cst {dimension_numbers = #tpu.dot_dimension_numbers<[1], [0], [0], [1], [0, 0, 1, 1], [], []>} : vector<8x16xf32>, vector<16x64xf32>, vector<8x64xf32> -> vector<8x64xf32>
    %c0_3 = arith.constant 0 : index
    %c0_4 = arith.constant 0 : index
    %3 = vector.load %arg3[%c0_3, %c0_4] : memref<1x64xf32, #tpu.memory_space<vmem>>, vector<1x64xf32>
    %4 = vector.broadcast %3 : vector<1x64xf32> to vector<8x64xf32>
    %5 = arith.addf %2, %4 : vector<8x64xf32>
    %cst_5 = arith.constant 0.000000e+00 : f32
    %6 = vector.broadcast %cst_5 : f32 to vector<8x64xf32>
    %7 = arith.maximumf %5, %6 : vector<8x64xf32>
    %c0_6 = arith.constant 0 : index
    %c0_7 = arith.constant 0 : index
    %8 = vector.load %arg4[%c0_6, %c0_7] : memref<64x128xf32, #tpu.memory_space<vmem>>, vector<64x128xf32>
    %cst_8 = arith.constant dense<0.000000e+00> : vector<8x128xf32>
    %9 = tpu.matmul %7, %8, %cst_8 {dimension_numbers = #tpu.dot_dimension_numbers<[1], [0], [0], [1], [0, 0, 1, 1], [], []>} : vector<8x64xf32>, vector<64x128xf32>, vector<8x128xf32> -> vector<8x128xf32>
    %c0_9 = arith.constant 0 : index
    %c0_10 = arith.constant 0 : index
    %10 = vector.load %arg5[%c0_9, %c0_10] : memref<1x128xf32, #tpu.memory_space<vmem>>, vector<1x128xf32>
    %11 = vector.broadcast %10 : vector<1x128xf32> to vector<8x128xf32>
    %12 = arith.addf %9, %11 : vector<8x128xf32>
    %c0_11 = arith.constant 0 : index
    %c0_12 = arith.constant 0 : index
    %13 = vector.load %arg6[%c0_11, %c0_12] : memref<8x128xf32, #tpu.memory_space<vmem>>, vector<8x128xf32>
    tpu.vector_store %arg6[%c0_11, %c0_12], %12 {strides = array<i32>} : memref<8x128xf32, #tpu.memory_space<vmem>>, vector<8x128xf32>,
    return
  }
  func.func @transform_0(%arg0: i32) -> (i32, i32) {
    %c0_i32 = arith.constant 0 : i32
    %c0_i32_0 = arith.constant 0 : i32
    return %arg0, %c0_i32 : i32, i32
  }
  func.func @transform_1(%arg0: i32) -> (i32, i32) {
    %c0_i32 = arith.constant 0 : i32
    %c0_i32_0 = arith.constant 0 : i32
    %c0_i32_1 = arith.constant 0 : i32
    return %c0_i32, %c0_i32_0 : i32, i32
  }
  func.func @transform_2(%arg0: i32) -> (i32, i32) {
    %c0_i32 = arith.constant 0 : i32
    %c0_i32_0 = arith.constant 0 : i32
    %c0_i32_1 = arith.constant 0 : i32
    return %c0_i32, %c0_i32_0 : i32, i32
  }
  func.func @transform_3(%arg0: i32) -> (i32, i32) {
    %c0_i32 = arith.constant 0 : i32
    %c0_i32_0 = arith.constant 0 : i32
    %c0_i32_1 = arith.constant 0 : i32
    return %c0_i32, %c0_i32_0 : i32, i32
  }
  func.func @transform_4(%arg0: i32) -> (i32, i32) {
    %c0_i32 = arith.constant 0 : i32
    %c0_i32_0 = arith.constant 0 : i32
    %c0_i32_1 = arith.constant 0 : i32
    return %c0_i32, %c0_i32_0 : i32, i32
  }
  func.func @transform_5(%arg0: i32) -> (i32, i32) {
    %c0_i32 = arith.constant 0 : i32
    %c0_i32_0 = arith.constant 0 : i32
    return %arg0, %c0_i32 : i32, i32
  }
}

</mosaic_0001>

<bundles_post_ra>
// kernel: tpu_custom_call.1
= control target key start
LH: loop header
LB: loop body
LE: loop exit
PB: predicated region body
PF: predicated region fallthrough
CT: control target
= control target key end

     0   :  { %10 = vsyncpa [#allocation3], 0  ;;  %s510_s0 = inlined_call_operand.hbm [shape: f32[8,16], index: 0, kind: input, shape index: {}]   ;;  %s511_s1 = inlined_call_operand.hbm [shape: f32[16,64], index: 1, kind: input, shape index: {}]   ;;  %s512_s2 = inlined_call_operand.vmem [shape: f32[1,64], index: 2, kind: input, shape index: {}]   ;;  %s513_s3 = inlined_call_operand.hbm [shape: f32[64,128], index: 3, kind: input, shape index: {}]   ;;  %s514_s4 = inlined_call_operand.vmem [shape: f32[1,128], index: 4, kind: input, shape index: {}]   ;;  %s515_s5 = inlined_call_operand.hbm [shape: f32[8,128], index: 5, kind: output, shape index: {}]  }
   0x1   :  { %11 = vsyncpa [#allocation6], 0 }
   0x2   :  { %12 = vsyncpa [#allocation4], 0  ;;  %s411_s18 = smov [#allocation5]   ;;  %s317_s22 = scalar_lea.hbm %s511_s1, 256 }
   0x3   :  { %s28_s19 = sshll.u32 %s411_s18, 4  ;;  %p318_p0 = scmp.ne.s32.totalorder %s511_s1, %s317_s22  ;;  %s29_s19 = int_to_ptr.vmem [resolvable:$true] %s28_s19 }
   0x4   :  { %p321_p1 = scmp.lt.u32.totalorder %s317_s22, %s511_s1 }
   0x6   :  { %p323_p2 = pnand %p321_p1, %p318_p0 }
   0x8   :  { %326 = shalt.err (!%p323_p2)
}
   0x9   :  { %s327_s27 = scalar_lea.vmem %s29_s19, 256  ;;  %p332_p4 = scmp.lt.s32.totalorder %s29_s19, %s29_s19 }
   0xa   :  { %p328_p3 = scmp.ne.s32.totalorder %s29_s19, %s327_s27  ;;  %p333_p5 = scmp.lt.s32.totalorder %s327_s27, %s327_s27 }
   0xc   :  { %p334_p6 = por %p333_p5, %p332_p4 }
   0xe   :  { %p335_p7 = pnand %p334_p6, %p328_p3 }
  0x10   :  { %338 = shalt.err (!%p335_p7)
}
  0x11   :  { %s412_s28 = smov 128   ;;  %s413_s29 = smov 8  }
  0x12   :  { %34 = dma.hbm_to_vmem [thread:$0]  %s511_s1, 256, %s29_s19, [#allocation6], %s412_s28, %s412_s28, %s413_s29  }
  0x13   :  { %s414_s7 = smov [#allocation2]   ;;  %s415_s9 = smov [#allocation7]  }
  0x14   :  { %s19_s8 = sshll.u32 %s414_s7, 4  ;;  %s42_s10 = sshll.u32 %s415_s9, 4  ;;  %s20_s8 = int_to_ptr.vmem [resolvable:$true] %s19_s8  ;;  %s43_s10 = int_to_ptr.vmem [resolvable:$true] %s42_s10 }
  0x15   :  { %s339_s13 = scalar_lea.hbm %s510_s0, 128 }
  0x16   :  { %p340_p8 = scmp.ne.s32.totalorder %s510_s0, %s339_s13  ;;  %p343_p9 = scmp.lt.u32.totalorder %s339_s13, %s510_s0 }
  0x18   :  { %p345_p10 = pnand %p343_p9, %p340_p8 }
  0x1a   :  { %348 = shalt.err (!%p345_p10)
}
  0x1b   :  { %s349_s1 = scalar_lea.vmem %s20_s8, 128  ;;  %p354_p12 = scmp.lt.s32.totalorder %s20_s8, %s20_s8 }
  0x1c   :  { %p350_p11 = scmp.ne.s32.totalorder %s20_s8, %s349_s1  ;;  %p355_p13 = scmp.lt.s32.totalorder %s349_s1, %s349_s1 }
  0x1e   :  { %p356_p0 = por %p355_p13, %p354_p12 }
  0x20   :  { %p357_p1 = pnand %p356_p0, %p350_p11 }
  0x22   :  { %360 = shalt.err (!%p357_p1)
}
  0x23   :  { %22 = dma.hbm_to_vmem [thread:$0]  %s510_s0, 128, %s20_s8, [#allocation3]  }
  0x24   :  { %s361_s22 = scalar_lea.hbm %s513_s3, 1024 }
  0x25   :  { %p362_p2 = scmp.ne.s32.totalorder %s513_s3, %s361_s22  ;;  %p365_p3 = scmp.lt.u32.totalorder %s361_s22, %s513_s3 }
  0x27   :  { %p367_p4 = pnand %p365_p3, %p362_p2 }
  0x29   :  { %370 = shalt.err (!%p367_p4)
}
  0x2a   :  { %s371_s27 = scalar_lea.vmem %s43_s10, 1024  ;;  %p376_p6 = scmp.lt.s32.totalorder %s43_s10, %s43_s10 }
  0x2b   :  { %p372_p5 = scmp.ne.s32.totalorder %s43_s10, %s371_s27  ;;  %p377_p7 = scmp.lt.s32.totalorder %s371_s27, %s371_s27 }
  0x2d   :  { %p378_p8 = por %p377_p7, %p376_p6 }
  0x2f   :  { %p379_p9 = pnand %p378_p8, %p372_p5 }
  0x31   :  { %382 = shalt.err (!%p379_p9)
}
  0x32   :  { %48 = dma.hbm_to_vmem [thread:$0]  %s513_s3, 1024, %s43_s10, [#allocation6], %s412_s28, %s412_s28, %s413_s29  }
  0x33   :  { %405 = dma.done.wait [#allocation3], 128  }
  0x34   :  { %406 = vsyncadd [#allocation3], 4294967168 }
  0x35   :  { %407 = dma.done.wait [#allocation6], 1280  }
  0x36   :  { %408 = vsyncadd [#allocation6], 4294966016  ;;  %v416_v0 = vmov 0.0|0.0   ;;  %vm417_vm0 = vmmov 0   ;;  %v418_v1 = vmov 0.0   ;;  %v61_v2 = vld [vmem:[#allocation5] sm:$0xff] }
  0x37   :  { %293 = vmatprep.subr.bf16.mxu0 %v416_v0  ;;  %271 = vmatprep.mubr.msk.f32.mxu0 %vm417_vm0, %v418_v1  ;;  %v62_v3 = vld [vmem:[#allocation5 + $0x8] sm:$0xff]  ;;  %v145_v5 = vld [vmem:[#allocation7] sm:$0xff]  ;;  %v146_v6 = vld [vmem:[#allocation7 + $0x8] sm:$0xff]  ;;  %vm70_vm1 = vcmask 130048   ;;  %vm160_vm2 = vcmask 523264   ;;  %s419_s7 = smov [#allocation8]  }
  0x38   :  { %296 = vmatprep.subr.bf16.mxu1 %v416_v0  ;;  %290 = vmatprep.mubr.msk.f32.mxu1 %vm417_vm0, %v418_v1  ;;  %v294_v4 = vpack.c.bf16 %v62_v3, %v61_v2  ;;  %v147_v7 = vld [vmem:[#allocation7 + $0x10] sm:$0xff]  ;;  %v297_v8 = vpack.c.bf16 %v146_v6, %v145_v5  ;;  %v148_v9 = vld [vmem:[#allocation7 + $0x18] sm:$0xff]  ;;  %v60_v10 = vld [vmem:[#allocation2] sm:$0xff]  ;;  %s241_s8 = sshll.u32 %s419_s7, 4  ;;  %s242_s8 = int_to_ptr.vmem [resolvable:$true] %s241_s8 }
  0x39   :  { %v300_v11 = vpack.c.bf16 %v148_v9, %v147_v7  ;;  %v149_v12 = vld [vmem:[#allocation7 + $0x20] sm:$0xff]  ;;  %v150_v13 = vld [vmem:[#allocation7 + $0x28] sm:$0xff]  ;;  %v151_v15 = vld [vmem:[#allocation7 + $0x30] sm:$0xff]  ;;  %s383_s9 = scalar_lea.vmem %s242_s8, 128  ;;  %p388_p11 = scmp.lt.s32.totalorder %s242_s8, %s242_s8 }
  0x3a   :  { %295 = vmatpush3.bf16.msra.mxu0 %v294_v4  ;;  %298 = vmatpush3.bf16.msra.mxu1 %v297_v8  ;;  %v303_v14 = vpack.c.bf16 %v150_v13, %v149_v12  ;;  %v152_v16 = vld [vmem:[#allocation7 + $0x38] sm:$0xff]  ;;  %v251_v18 = vld [vmem:[%s512_s2] ss:$0 sm:$0xff]  ;;  %p384_p10 = scmp.ne.s32.totalorder %s242_s8, %s383_s9  ;;  %p389_p12 = scmp.lt.s32.totalorder %s383_s9, %s383_s9 }
  0x3b   :  { %299 = vmatprep.subr.bf16.mxu1 %v416_v0  ;;  %v306_v17 = vpack.c.bf16 %v152_v16, %v151_v15  ;;  %v253_v23 = vld [vmem:[%s514_s4] ss:$0 sm:$0xff] }
  0x3c   :  { %p390_p13 = por %p389_p12, %p388_p11 }
  0x3d   :  { %272 = vmatmul.mubr.msk.f32.vlgmr.msra.gmra.mrb[0].mxu0 %vm70_vm1, %v60_v10 }
  0x3e   :  { %301 = vmatpush3.bf16.msra.mxu1 %v300_v11  ;;  %p391_p0 = pnand %p390_p13, %p384_p10 }
  0x3f   :  { %302 = vmatprep.subr.bf16.mxu1 %v416_v0 }
  0x42   :  { %304 = vmatpush3.bf16.msra.mxu1 %v303_v14 }
  0x43   :  { %305 = vmatprep.subr.bf16.mxu1 %v416_v0 }
  0x46   :  { %307 = vmatpush3.bf16.msra.mxu1 %v306_v17 }
 0x110   :  { %v140_v19 = vpop.f32.mrb[0].mxu0 }
 0x111   :  { %v141_v20 = vadd.f32 %v251_v18, %v140_v19  ;;  %v273_v21 = vpop.f32.mrb[1].mxu0 }
 0x113   :  { %v144_v22 = vmax.f32 %v141_v20, 0.0 }
 0x115   :  { %291 = vmatmul.mubr.msk.f32.vlgmr.msra.gmra.mrb[0].mxu1 %vm160_vm2, %v144_v22 }
 0x1e8   :  { %v230_v24 = vpop.f32.mrb[0].mxu1 }
 0x1e9   :  { %v231_v25 = vadd.f32 %v253_v23, %v230_v24  ;;  %v292_v26 = vpop.f32.mrb[1].mxu1 }
 0x1eb   :  { %234 = vst [vmem:[#allocation8] sm:$0xff] %v231_v25 }
 0x1ec   :  { %394 = shalt.err (!%p391_p0)
}
 0x1ed   :  { %s395_s11 = scalar_lea.hbm %s515_s5, 128 }
 0x1ee   :  { %p396_p1 = scmp.ne.s32.totalorder %s515_s5, %s395_s11  ;;  %p399_p2 = scmp.lt.u32.totalorder %s395_s11, %s515_s5 }
 0x1f0   :  { %p401_p3 = pnand %p399_p2, %p396_p1 }
 0x1f2   :  { %404 = shalt.err (!%p401_p3)
}
 0x1f3   :  { %244 = dma.vmem_to_hbm [thread:$0]  %s242_s8, 128, %s515_s5, [#allocation4]  }
 0x1f4   :  { %409 = dma.done.wait [#allocation4], 128  }
 0x1f5   :  { %410 = vsyncadd [#allocation4], 4294967168 }
 0x1f6   :  { %248 = vsyncpa [#allocation3], 1 }
 0x1f7   :  { %249 = vsyncpa [#allocation6], 1 }
 0x1f8   :  { %250 = vsyncpa [#allocation4], 1 }

</bundles_post_ra>
